<compile_context>
chip_gen: v7x
topology: tpu7x:2x2x1
jax: 0.10.0
libtpu: 0.0.40
codegen_flags: <defaults>
</compile_context>

<pallas_src>
import functools

import jax
import jax.numpy as jnp
from jax import lax
from jax.experimental import pallas as pl
from jax.experimental.pallas import tpu as pltpu


_LANE = 128
_SUBLANE = 8


def _round_up(x, m):
    return (x + m - 1) // m * m


def _next_pow2(x):
    return 1 if x <= 1 else 1 << (int(x) - 1).bit_length()


def _vmem_capacity_bytes():
    """Physical VMEM per core; conservative fallback if the query fails."""
    try:
        info = pltpu.get_tpu_info()
        cap = int(getattr(info, "vmem_capacity_bytes"))
        if cap > 0:
            return cap
    except Exception:
        pass
    return 64 * 1024 * 1024   # v7x-sized fallback, safe on every generation


# ----------------------------------------------------------------------------
# Pallas kernel: stacked-tap (im2col-in-VMEM) tile -> one MXU matmul
#                + fused bias + ReLU
# ----------------------------------------------------------------------------
def _conv_fold_kernel(xa_ref, xb_ref, w_ref, b_ref, o_ref, stk_ref,
                      *, K, W, C, KKC):
    # xa_ref : (C, TW)          spatial tile j of the flattened image
    # xb_ref : (C, HALO_PAD)    first HALO_PAD columns of tile j+1 (halo)
    # w_ref  : (OC_pad, KKC_PAD) weight, column (kh*K + kw)*C + c
    # b_ref  : (OC_pad, 1)      bias column
    # o_ref  : (OC_pad, TW)     output tile; tile-local column p = oh*W + ow
    # stk_ref: (KKC_PAD, TW)    stacked im2col RHS (rebuilt every step)
    tw = o_ref.shape[-1]
    for t in range(K * K):                       # static, unrolled (K*K = 9)
        kh, kw = divmod(t, K)
        off = kh * W + kw                        # static shift on flat spatial axis
        if off == 0:
            tap = xa_ref[...]
        else:                                    # window [off, off+TW) spans a|b
            tap = jnp.concatenate([xa_ref[:, off:], xb_ref[:, :off]], axis=-1)
        stk_ref[t * C:(t + 1) * C, :] = tap
    if stk_ref.shape[0] > KKC:                   # zero the sublane-alignment pad rows
        stk_ref[KKC:, :] = jnp.zeros((stk_ref.shape[0] - KKC, tw), stk_ref.dtype)
    acc = jnp.dot(w_ref[...], stk_ref[...], preferred_element_type=jnp.float32)
    acc = acc + b_ref[...]                       # (OC_pad, 1) broadcast over lanes
    o_ref[...] = jnp.maximum(acc, 0.0).astype(o_ref.dtype)


# ----------------------------------------------------------------------------
# ConvolutionalBlock forward (Conv2d k=3, pad=0, bias=True  ->  ReLU)
# ----------------------------------------------------------------------------
def convolutional_block_forward(x, weight, bias, *, kernel_size=3):
    """x: [N, C, H, W] (NCHW), weight: [OC, C, K, K], bias: [OC] -> [N, OC, OH, OW]."""
    N, C, H, W = x.shape
    OC = weight.shape[0]
    K = kernel_size
    OH, OW = H - K + 1, W - K + 1               # padding=0, dilation=1, stride=1
    HW = H * W
    OHW = OH * W                                # computed flat output columns (stride W)

    oc_pad = _round_up(OC, _SUBLANE)
    KKC = K * K * C
    KKC_PAD = _round_up(KKC, _SUBLANE)
    halo = (K - 1) * (W + 1)                    # largest tap shift
    halo_pad = _LANE * _next_pow2(-(-halo // _LANE))   # 128*2^k >= halo (divides TW)
    itemsize = jnp.dtype(x.dtype).itemsize

    # ---- generation-aware VMEM budget ---------------------------------------
    cap = _vmem_capacity_bytes()                # 64 MiB (v7x) / 128 MiB (v5e/v6e)
    budget = max(min((cap * 3) // 4, cap - (16 << 20)), 16 << 20)

    def step_vmem(t):                           # per-step live VMEM estimate
        return itemsize * (2 * C * t            # x tile (double-buffered)
                           + 2 * C * halo_pad   # halo tile
                           + 2 * oc_pad * t     # output tile
                           + 2 * oc_pad * (KKC_PAD + 1)   # resident weight + bias
                           + KKC_PAD * t)       # stacked-RHS scratch

    # ---- largest lane-aligned spatial tile that fits the budget -------------
    tw_full = _round_up(OHW, _LANE)
    tw_min = halo_pad if halo_pad > halo else 2 * halo_pad   # TW must exceed the halo
    cands = [t for t in (8192, 4096, 2048, 1024, 512, 256, 128)
             if tw_min <= t <= max(tw_full, tw_min)]
    if not cands:
        cands = [tw_min]
    TW = cands[-1]
    for t in cands:                             # descending: first fit == largest fit
        if step_vmem(t) <= budget:
            TW = t
            break
    OUT_W = _round_up(OHW, TW)                  # lane-dense output width
    HW_IN = OUT_W + halo_pad                    # padded flat input width
    num_tiles = OUT_W // TW
    halo_stride = TW // halo_pad                # halo-blocks per spatial tile (exact)

    need = step_vmem(TW)
    vmem_limit = max((need * 5) // 4, 32 << 20)
    vmem_limit = int(min(vmem_limit, max(cap - (16 << 20), 32 << 20)))

    # ---- cheap one-time host repacks (no 9x im2col, no layout transposes) ---
    x2 = jnp.pad(x.reshape(N, C, HW), ((0, 0), (0, 0), (0, HW_IN - HW)))
    w2 = weight.transpose(0, 2, 3, 1).reshape(OC, KKC)     # col = (kh*K + kw)*C + c
    w2 = jnp.pad(w2, ((0, oc_pad - OC), (0, KKC_PAD - KKC)))
    b2 = jnp.pad(bias.astype(jnp.float32).reshape(OC, 1), ((0, oc_pad - OC), (0, 0)))

    kernel = functools.partial(_conv_fold_kernel, K=K, W=W, C=C, KKC=KKC)
    out = pl.pallas_call(
        kernel,
        out_shape=jax.ShapeDtypeStruct((N, oc_pad, OUT_W), x.dtype),
        grid_spec=pltpu.PrefetchScalarGridSpec(
            num_scalar_prefetch=0,
            grid=(N, num_tiles),
            in_specs=[
                pl.BlockSpec((None, C, TW), lambda n, j: (n, 0, j)),
                pl.BlockSpec((None, C, halo_pad),
                             lambda n, j: (n, 0, (j + 1) * halo_stride)),
                pl.BlockSpec((oc_pad, KKC_PAD), lambda n, j: (0, 0)),
                pl.BlockSpec((oc_pad, 1), lambda n, j: (0, 0)),
            ],
            out_specs=pl.BlockSpec((None, oc_pad, TW), lambda n, j: (n, 0, j)),
            scratch_shapes=[pltpu.VMEM((KKC_PAD, TW), x.dtype)],
        ),
        compiler_params=pltpu.CompilerParams(
            dimension_semantics=("parallel", "parallel"),
            vmem_limit_bytes=vmem_limit,
        ),
    )(x2, x2, w2, b2)

    # kernel column oh*W + ow holds out[n, oc, oh, ow]; drop wrap/pad garbage
    out = out[:, :OC, :OHW].reshape(N, OC, OH, W)[:, :, :, :OW]
    return out


# ----------------------------------------------------------------------------
# Reference (pure JAX / XLA conv) for correctness check
# ----------------------------------------------------------------------------
def _reference(x, weight, bias):
    y = lax.conv_general_dilated(
        x, weight, window_strides=(1, 1), padding="VALID",
        dimension_numbers=("NCHW", "OIHW", "NCHW"))
    y = y + bias.reshape(1, -1, 1, 1)
    return jnp.maximum(y, 0.0)


if __name__ == "__main__":
    key = jax.random.PRNGKey(0)
    k_x, k_w, k_b = jax.random.split(key, 3)

    N, C, H, W = 2, 4, 16, 16
    OC, K = 8, 3

    x = jax.random.normal(k_x, (N, C, H, W), dtype=jnp.float32)
    # deterministic, PyTorch-like uniform init scale
    fan_in = C * K * K
    bound = 1.0 / (fan_in ** 0.5)
    weight = jax.random.uniform(k_w, (OC, C, K, K), jnp.float32, -bound, bound)
    bias = jax.random.uniform(k_b, (OC,), jnp.float32, -bound, bound)

    fwd = jax.jit(convolutional_block_forward)
    out = jax.block_until_ready(fwd(x, weight, bias))
    ref = jax.block_until_ready(_reference(x, weight, bias))

    assert out.shape == (N, OC, H - K + 1, W - K + 1), out.shape
    err = float(jnp.max(jnp.abs(out - ref)))
    assert jnp.allclose(out, ref, atol=1e-3, rtol=1e-3), err

    print("KERNEL_OK")
</pallas_src>

<mosaic_0001>
module attributes {stable_mosaic.version = 11 : i64} {
  func.func @_conv_fold_kernel(%arg0: i32, %arg1: i32, %arg2: memref<1x4x256xf32, #tpu.memory_space<vmem>>, %arg3: memref<1x4x128xf32, #tpu.memory_space<vmem>>, %arg4: memref<8x40xf32, #tpu.memory_space<vmem>>, %arg5: memref<8x1xf32, #tpu.memory_space<vmem>>, %arg6: memref<1x8x256xf32, #tpu.memory_space<vmem>>, %arg7: memref<40x256xf32, #tpu.memory_space<vmem>>) attributes {dimension_semantics = [#tpu.dimension_semantics<parallel>, #tpu.dimension_semantics<parallel>], iteration_bounds = array<i64: 2, 1>, scalar_prefetch = 0 : i64, scratch_operands = 1 : i64, tpu.core_type = #tpu.core_type<tc>, window_params = [{transform_indices = @transform_0, window_bounds = array<i64: 1, 4, 256>}, {transform_indices = @transform_1, window_bounds = array<i64: 1, 4, 128>}, {pipeline_mode = #tpu.pipeline_mode<synchronous>, transform_indices = @transform_2, window_bounds = array<i64: 8, 40>}, {pipeline_mode = #tpu.pipeline_mode<synchronous>, transform_indices = @transform_3, window_bounds = array<i64: 8, 1>}, {transform_indices = @transform_4, window_bounds = array<i64: 1, 8, 256>}]} {
    %c0 = arith.constant 0 : index
    %c0_0 = arith.constant 0 : index
    %c0_1 = arith.constant 0 : index
    %0 = vector.load %arg2[%c0, %c0_0, %c0_1] : memref<1x4x256xf32, #tpu.memory_space<vmem>>, vector<1x4x256xf32>
    %1 = vector.shape_cast %0 : vector<1x4x256xf32> to vector<4x256xf32>
    %c0_2 = arith.constant 0 : index
    %c0_3 = arith.constant 0 : index
    %2 = vector.load %arg7[%c0_2, %c0_3] : memref<40x256xf32, #tpu.memory_space<vmem>>, vector<4x256xf32>
    tpu.vector_store %arg7[%c0_2, %c0_3], %1 {strides = array<i32>} : memref<40x256xf32, #tpu.memory_space<vmem>>, vector<4x256xf32>,
    %c0_4 = arith.constant 0 : index
    %c0_5 = arith.constant 0 : index
    %c1 = arith.constant 1 : index
    %3 = vector.load %arg2[%c0_4, %c0_5, %c1] : memref<1x4x256xf32, #tpu.memory_space<vmem>>, vector<1x4x255xf32>
    %4 = vector.shape_cast %3 : vector<1x4x255xf32> to vector<4x255xf32>
    %c0_6 = arith.constant 0 : index
    %c0_7 = arith.constant 0 : index
    %c0_8 = arith.constant 0 : index
    %5 = vector.load %arg3[%c0_6, %c0_7, %c0_8] : memref<1x4x128xf32, #tpu.memory_space<vmem>>, vector<1x4x1xf32>
    %6 = vector.shape_cast %5 : vector<1x4x1xf32> to vector<4x1xf32>
    %7 = tpu.concatenate %4, %6 in 1 : vector<4x255xf32>, vector<4x1xf32> -> vector<4x256xf32>
    %c4 = arith.constant 4 : index
    %c0_9 = arith.constant 0 : index
    %8 = vector.load %arg7[%c4, %c0_9] : memref<40x256xf32, #tpu.memory_space<vmem>>, vector<4x256xf32>
    tpu.vector_store %arg7[%c4, %c0_9], %7 {strides = array<i32>} : memref<40x256xf32, #tpu.memory_space<vmem>>, vector<4x256xf32>,
    %c0_10 = arith.constant 0 : index
    %c0_11 = arith.constant 0 : index
    %c2 = arith.constant 2 : index
    %9 = vector.load %arg2[%c0_10, %c0_11, %c2] : memref<1x4x256xf32, #tpu.memory_space<vmem>>, vector<1x4x254xf32>
    %10 = vector.shape_cast %9 : vector<1x4x254xf32> to vector<4x254xf32>
    %c0_12 = arith.constant 0 : index
    %c0_13 = arith.constant 0 : index
    %c0_14 = arith.constant 0 : index
    %11 = vector.load %arg3[%c0_12, %c0_13, %c0_14] : memref<1x4x128xf32, #tpu.memory_space<vmem>>, vector<1x4x2xf32>
    %12 = vector.shape_cast %11 : vector<1x4x2xf32> to vector<4x2xf32>
    %13 = tpu.concatenate %10, %12 in 1 : vector<4x254xf32>, vector<4x2xf32> -> vector<4x256xf32>
    %c8 = arith.constant 8 : index
    %c0_15 = arith.constant 0 : index
    %14 = vector.load %arg7[%c8, %c0_15] : memref<40x256xf32, #tpu.memory_space<vmem>>, vector<4x256xf32>
    tpu.vector_store %arg7[%c8, %c0_15], %13 {strides = array<i32>} : memref<40x256xf32, #tpu.memory_space<vmem>>, vector<4x256xf32>,
    %c0_16 = arith.constant 0 : index
    %c0_17 = arith.constant 0 : index
    %c16 = arith.constant 16 : index
    %15 = vector.load %arg2[%c0_16, %c0_17, %c16] : memref<1x4x256xf32, #tpu.memory_space<vmem>>, vector<1x4x240xf32>
    %16 = vector.shape_cast %15 : vector<1x4x240xf32> to vector<4x240xf32>
    %c0_18 = arith.constant 0 : index
    %c0_19 = arith.constant 0 : index
    %c0_20 = arith.constant 0 : index
    %17 = vector.load %arg3[%c0_18, %c0_19, %c0_20] : memref<1x4x128xf32, #tpu.memory_space<vmem>>, vector<1x4x16xf32>
    %18 = vector.shape_cast %17 : vector<1x4x16xf32> to vector<4x16xf32>
    %19 = tpu.concatenate %16, %18 in 1 : vector<4x240xf32>, vector<4x16xf32> -> vector<4x256xf32>
    %c12 = arith.constant 12 : index
    %c0_21 = arith.constant 0 : index
    %20 = vector.load %arg7[%c12, %c0_21] : memref<40x256xf32, #tpu.memory_space<vmem>>, vector<4x256xf32>
    tpu.vector_store %arg7[%c12, %c0_21], %19 {strides = array<i32>} : memref<40x256xf32, #tpu.memory_space<vmem>>, vector<4x256xf32>,
    %c0_22 = arith.constant 0 : index
    %c0_23 = arith.constant 0 : index
    %c17 = arith.constant 17 : index
    %21 = vector.load %arg2[%c0_22, %c0_23, %c17] : memref<1x4x256xf32, #tpu.memory_space<vmem>>, vector<1x4x239xf32>
    %22 = vector.shape_cast %21 : vector<1x4x239xf32> to vector<4x239xf32>
    %c0_24 = arith.constant 0 : index
    %c0_25 = arith.constant 0 : index
    %c0_26 = arith.constant 0 : index
    %23 = vector.load %arg3[%c0_24, %c0_25, %c0_26] : memref<1x4x128xf32, #tpu.memory_space<vmem>>, vector<1x4x17xf32>
    %24 = vector.shape_cast %23 : vector<1x4x17xf32> to vector<4x17xf32>
    %25 = tpu.concatenate %22, %24 in 1 : vector<4x239xf32>, vector<4x17xf32> -> vector<4x256xf32>
    %c16_27 = arith.constant 16 : index
    %c0_28 = arith.constant 0 : index
    %26 = vector.load %arg7[%c16_27, %c0_28] : memref<40x256xf32, #tpu.memory_space<vmem>>, vector<4x256xf32>
    tpu.vector_store %arg7[%c16_27, %c0_28], %25 {strides = array<i32>} : memref<40x256xf32, #tpu.memory_space<vmem>>, vector<4x256xf32>,
    %c0_29 = arith.constant 0 : index
    %c0_30 = arith.constant 0 : index
    %c18 = arith.constant 18 : index
    %27 = vector.load %arg2[%c0_29, %c0_30, %c18] : memref<1x4x256xf32, #tpu.memory_space<vmem>>, vector<1x4x238xf32>
    %28 = vector.shape_cast %27 : vector<1x4x238xf32> to vector<4x238xf32>
    %c0_31 = arith.constant 0 : index
    %c0_32 = arith.constant 0 : index
    %c0_33 = arith.constant 0 : index
    %29 = vector.load %arg3[%c0_31, %c0_32, %c0_33] : memref<1x4x128xf32, #tpu.memory_space<vmem>>, vector<1x4x18xf32>
    %30 = vector.shape_cast %29 : vector<1x4x18xf32> to vector<4x18xf32>
    %31 = tpu.concatenate %28, %30 in 1 : vector<4x238xf32>, vector<4x18xf32> -> vector<4x256xf32>
    %c20 = arith.constant 20 : index
    %c0_34 = arith.constant 0 : index
    %32 = vector.load %arg7[%c20, %c0_34] : memref<40x256xf32, #tpu.memory_space<vmem>>, vector<4x256xf32>
    tpu.vector_store %arg7[%c20, %c0_34], %31 {strides = array<i32>} : memref<40x256xf32, #tpu.memory_space<vmem>>, vector<4x256xf32>,
    %c0_35 = arith.constant 0 : index
    %c0_36 = arith.constant 0 : index
    %c32 = arith.constant 32 : index
    %33 = vector.load %arg2[%c0_35, %c0_36, %c32] : memref<1x4x256xf32, #tpu.memory_space<vmem>>, vector<1x4x224xf32>
    %34 = vector.shape_cast %33 : vector<1x4x224xf32> to vector<4x224xf32>
    %c0_37 = arith.constant 0 : index
    %c0_38 = arith.constant 0 : index
    %c0_39 = arith.constant 0 : index
    %35 = vector.load %arg3[%c0_37, %c0_38, %c0_39] : memref<1x4x128xf32, #tpu.memory_space<vmem>>, vector<1x4x32xf32>
    %36 = vector.shape_cast %35 : vector<1x4x32xf32> to vector<4x32xf32>
    %37 = tpu.concatenate %34, %36 in 1 : vector<4x224xf32>, vector<4x32xf32> -> vector<4x256xf32>
    %c24 = arith.constant 24 : index
    %c0_40 = arith.constant 0 : index
    %38 = vector.load %arg7[%c24, %c0_40] : memref<40x256xf32, #tpu.memory_space<vmem>>, vector<4x256xf32>
    tpu.vector_store %arg7[%c24, %c0_40], %37 {strides = array<i32>} : memref<40x256xf32, #tpu.memory_space<vmem>>, vector<4x256xf32>,
    %c0_41 = arith.constant 0 : index
    %c0_42 = arith.constant 0 : index
    %c33 = arith.constant 33 : index
    %39 = vector.load %arg2[%c0_41, %c0_42, %c33] : memref<1x4x256xf32, #tpu.memory_space<vmem>>, vector<1x4x223xf32>
    %40 = vector.shape_cast %39 : vector<1x4x223xf32> to vector<4x223xf32>
    %c0_43 = arith.constant 0 : index
    %c0_44 = arith.constant 0 : index
    %c0_45 = arith.constant 0 : index
    %41 = vector.load %arg3[%c0_43, %c0_44, %c0_45] : memref<1x4x128xf32, #tpu.memory_space<vmem>>, vector<1x4x33xf32>
    %42 = vector.shape_cast %41 : vector<1x4x33xf32> to vector<4x33xf32>
    %43 = tpu.concatenate %40, %42 in 1 : vector<4x223xf32>, vector<4x33xf32> -> vector<4x256xf32>
    %c28 = arith.constant 28 : index
    %c0_46 = arith.constant 0 : index
    %44 = vector.load %arg7[%c28, %c0_46] : memref<40x256xf32, #tpu.memory_space<vmem>>, vector<4x256xf32>
    tpu.vector_store %arg7[%c28, %c0_46], %43 {strides = array<i32>} : memref<40x256xf32, #tpu.memory_space<vmem>>, vector<4x256xf32>,
    %c0_47 = arith.constant 0 : index
    %c0_48 = arith.constant 0 : index
    %c34 = arith.constant 34 : index
    %45 = vector.load %arg2[%c0_47, %c0_48, %c34] : memref<1x4x256xf32, #tpu.memory_space<vmem>>, vector<1x4x222xf32>
    %46 = vector.shape_cast %45 : vector<1x4x222xf32> to vector<4x222xf32>
    %c0_49 = arith.constant 0 : index
    %c0_50 = arith.constant 0 : index
    %c0_51 = arith.constant 0 : index
    %47 = vector.load %arg3[%c0_49, %c0_50, %c0_51] : memref<1x4x128xf32, #tpu.memory_space<vmem>>, vector<1x4x34xf32>
    %48 = vector.shape_cast %47 : vector<1x4x34xf32> to vector<4x34xf32>
    %49 = tpu.concatenate %46, %48 in 1 : vector<4x222xf32>, vector<4x34xf32> -> vector<4x256xf32>
    %c32_52 = arith.constant 32 : index
    %c0_53 = arith.constant 0 : index
    %50 = vector.load %arg7[%c32_52, %c0_53] : memref<40x256xf32, #tpu.memory_space<vmem>>, vector<4x256xf32>
    tpu.vector_store %arg7[%c32_52, %c0_53], %49 {strides = array<i32>} : memref<40x256xf32, #tpu.memory_space<vmem>>, vector<4x256xf32>,
    %cst = arith.constant 0.000000e+00 : f32
    %51 = vector.broadcast %cst : f32 to vector<4x256xf32>
    %c36 = arith.constant 36 : index
    %c0_54 = arith.constant 0 : index
    %52 = vector.load %arg7[%c36, %c0_54] : memref<40x256xf32, #tpu.memory_space<vmem>>, vector<4x256xf32>
    tpu.vector_store %arg7[%c36, %c0_54], %51 {strides = array<i32>} : memref<40x256xf32, #tpu.memory_space<vmem>>, vector<4x256xf32>,
    %c0_55 = arith.constant 0 : index
    %c0_56 = arith.constant 0 : index
    %53 = vector.load %arg4[%c0_55, %c0_56] : memref<8x40xf32, #tpu.memory_space<vmem>>, vector<8x40xf32>
    %c0_57 = arith.constant 0 : index
    %c0_58 = arith.constant 0 : index
    %54 = vector.load %arg7[%c0_57, %c0_58] : memref<40x256xf32, #tpu.memory_space<vmem>>, vector<40x256xf32>
    %cst_59 = arith.constant dense<0.000000e+00> : vector<8x256xf32>
    %55 = tpu.matmul %53, %54, %cst_59 {dimension_numbers = #tpu.dot_dimension_numbers<[1], [0], [0], [1], [0, 0, 1, 1], [], []>} : vector<8x40xf32>, vector<40x256xf32>, vector<8x256xf32> -> vector<8x256xf32>
    %c0_60 = arith.constant 0 : index
    %c0_61 = arith.constant 0 : index
    %56 = vector.load %arg5[%c0_60, %c0_61] : memref<8x1xf32, #tpu.memory_space<vmem>>, vector<8x1xf32>
    %57 = vector.broadcast %56 : vector<8x1xf32> to vector<8x256xf32>
    %58 = arith.addf %55, %57 : vector<8x256xf32>
    %cst_62 = arith.constant 0.000000e+00 : f32
    %59 = vector.broadcast %cst_62 : f32 to vector<8x256xf32>
    %60 = arith.maximumf %58, %59 : vector<8x256xf32>
    %c0_63 = arith.constant 0 : index
    %c0_64 = arith.constant 0 : index
    %c0_65 = arith.constant 0 : index
    %61 = vector.load %arg6[%c0_63, %c0_64, %c0_65] : memref<1x8x256xf32, #tpu.memory_space<vmem>>, vector<1x8x256xf32>
    %62 = vector.shape_cast %61 : vector<1x8x256xf32> to vector<8x256xf32>
    %63 = vector.shape_cast %60 : vector<8x256xf32> to vector<1x8x256xf32>
    tpu.vector_store %arg6[%c0_63, %c0_64, %c0_65], %63 {strides = array<i32>} : memref<1x8x256xf32, #tpu.memory_space<vmem>>, vector<1x8x256xf32>,
    return
  }
  func.func @transform_0(%arg0: i32, %arg1: i32) -> (i32, i32, i32) {
    %c0_i32 = arith.constant 0 : i32
    %c0_i32_0 = arith.constant 0 : i32
    return %arg0, %c0_i32, %arg1 : i32, i32, i32
  }
  func.func @transform_1(%arg0: i32, %arg1: i32) -> (i32, i32, i32) {
    %c1_i32 = arith.constant 1 : i32
    %0 = arith.addi %arg1, %c1_i32 : i32
    %c2_i32 = arith.constant 2 : i32
    %1 = arith.muli %0, %c2_i32 : i32
    %c0_i32 = arith.constant 0 : i32
    %c0_i32_0 = arith.constant 0 : i32
    return %arg0, %c0_i32, %1 : i32, i32, i32
  }
  func.func @transform_2(%arg0: i32, %arg1: i32) -> (i32, i32) {
    %c0_i32 = arith.constant 0 : i32
    %c0_i32_0 = arith.constant 0 : i32
    %c0_i32_1 = arith.constant 0 : i32
    return %c0_i32, %c0_i32_0 : i32, i32
  }
  func.func @transform_3(%arg0: i32, %arg1: i32) -> (i32, i32) {
    %c0_i32 = arith.constant 0 : i32
    %c0_i32_0 = arith.constant 0 : i32
    %c0_i32_1 = arith.constant 0 : i32
    return %c0_i32, %c0_i32_0 : i32, i32
  }
  func.func @transform_4(%arg0: i32, %arg1: i32) -> (i32, i32, i32) {
    %c0_i32 = arith.constant 0 : i32
    %c0_i32_0 = arith.constant 0 : i32
    return %arg0, %c0_i32, %arg1 : i32, i32, i32
  }
}

</mosaic_0001>

<bundles_post_ra>
// kernel: convolutional_block_forward.1
= control target key start
LH: loop header
LB: loop body
LE: loop exit
PB: predicated region body
PF: predicated region fallthrough
CT: control target
= control target key end

     0   :  { %s800_s15 = smov 0   ;;  %s802_s16 = smov 0   ;;  %s860_s0 = inlined_call_operand.vmem [shape: f32[2,4,384], index: 0, kind: input, shape index: {}, may-alias: {0,1}]   ;;  %s861_s1 = inlined_call_operand.vmem [shape: f32[2,4,384], index: 1, kind: input, shape index: {}, may-alias: {0,1}]   ;;  %s862_s2 = inlined_call_operand.vmem [shape: f32[8,40], index: 2, kind: input, shape index: {}]   ;;  %s863_s3 = inlined_call_operand.vmem [shape: f32[8,1], index: 3, kind: input, shape index: {}]   ;;  %s864_s4 = inlined_call_operand.vmem [shape: f32[2,8,256], index: 4, kind: output, shape index: {}]  }
   0x1   :  { %s804_s17 = smov 0  }
   0x2 LB: > { %s26_s18 = sadd.s32 1, %s759_s16  ;;  %p683_p0 = scmp.ge.s32.totalorder %s763_s17, 1  ;;  %s763_s17 = sphi %s804_s17, %s14_s17   ;;  %s759_s16 = sphi %s802_s16, %s866_s16   ;;  %s755_s15 = sphi %s800_s15, %s865_s15  }
   0x3   : > { %p28_p1 = scmp.ge.s32.totalorder %s26_s18, 2  ;;  %p214_p2 = scmp.lt.s32.totalorder %s763_s17, 3 }
   0x5   : > { %s868_s18 = smov (%p28_p1, %s26_s18), 0  ;;  %p215_p3 = pnand %p683_p0, %p214_p2 }
   0x6   : > { %p267_p4 = scmp.lt.s32.totalorder (!%p215_p3), %s755_s15, 1  ;;  %s765_s27 = smov (!%p215_p3), 112   ;;  %v772_v8 = vmov (!%p215_p3), 0.0   ;;  %v774_v11 = vmov (!%p215_p3), 0   ;;  %v489_v12 = vld [vmem:[%s863_s3] sm:$0xff] (!%p215_p3)  ;;  %vm358_vm0 = vcmask (!%p215_p3), 916480  }
   0x7   : > { %218 = sbr.rel (%p215_p3) target bundleno = 408 (0x198), region = 36  ;;  %s766_s28 = smov (!%p215_p3), 127   ;;  %477 = vst [vmem:[#allocation2 + $0x48] sm:$0xf0] (!%p215_p3), %v772_v8  ;;  %476 = vst [vmem:[#allocation2 + $0x40] sm:$0xf0] (!%p215_p3), %v772_v8  ;;  %563 = vmatprep.mubr.f32.mxu0 (!%p215_p3), %v772_v8  ;;  %739 = vset.pattern.permute.xlu0 (!%p215_p3), %v774_v11 }
   0x8   : > { %s767_s29 = smov (!%p215_p3), 126   ;;  %s768_s30 = smov (!%p215_p3), 110   ;;  %vm316_vm1 = vcmask (!%p215_p3), 1039360   ;;  %vm339_vm2 = vcmask (!%p215_p3), 1031168   ;;  %vm400_vm3 = vcmask (!%p215_p3), 900096   ;;  %vm442_vm4 = vcmask (!%p215_p3), 777216  }
   0x9   : > { %s769_s5 = smov (!%p215_p3), 95   ;;  %s770_s6 = smov (!%p215_p3), 111   ;;  %vm381_vm5 = vcmask (!%p215_p3), 908288   ;;  %vm423_vm6 = vcmask (!%p215_p3), 785408   ;;  %vm465_vm7 = vcmask (!%p215_p3), 769024   ;;  %vm495_vm8 = vcmask (!%p215_p3), 326656  }
   0xa   : > { %s771_s7 = smov (!%p215_p3), 96   ;;  %s773_s8 = smov (!%p215_p3), 94  }
   0xe   : > { %s870_s15 = smov (!%p267_p4, %s755_s15), 1 }
   0xf   : > { %s702_s19 = smul.u32 12, %s870_s15  ;;  %s693_s13 = sshll.u32 %s870_s15, 4 }
  0x10   : > { %s300_s20 = scalar_lea.vmem %s864_s4, %s693_s13 }
  0x11   : > { %s274_s22 = scalar_lea.vmem %s860_s0, %s702_s19  ;;  %s692_s23 = sadd.s32 8, %s702_s19 }
  0x12   : > { %v350_v0 = vld [vmem:[%s274_s22] sm:$0xff]  ;;  %s827_s26 = scalar_lea.vmem %s861_s1, %s692_s23 }
  0x13   : > { %354 = vrot.lane.b32.xlu1 %v350_v0, %s765_s27  ;;  %v353_v1 = vcombine.high %v350_v0, %v350_v0  ;;  %312 = vrot.lane.b32.xlu0 %v350_v0, %s766_s28  ;;  %306 = vst [vmem:[#allocation2] sm:$0xf] %v350_v0  ;;  %v351_v2 = vld [vmem:[%s827_s26] sm:$0xf] }
  0x14   : > { %v309_v3 = vld [vmem:[%s827_s26] sm:$0xf] }
  0x15   : > { %307 = vst [vmem:[#allocation2 + $0x8] sm:$0xf] %v353_v1  ;;  %v332_v4 = vld [vmem:[%s827_s26] sm:$0xf] }
  0x16   : > { %v393_v5 = vld [vmem:[%s827_s26] sm:$0xf] }
  0x17   : > { %362 = vrot.lane.b32.xlu1 %v351_v2, %s765_s27  ;;  %320 = vrot.lane.b32.xlu0 %v309_v3, %s766_s28  ;;  %v435_v6 = vld [vmem:[%s827_s26] sm:$0xf] }
  0x18   : > { %v374_v7 = vld [vmem:[%s827_s26] sm:$0xf] }
  0x19   : > { %v416_v9 = vld [vmem:[%s827_s26] sm:$0xf] }
  0x1a   : > { %v458_v10 = vld [vmem:[%s827_s26] sm:$0xf] }
  0x1b   : > { %356 = vrot.lane.b32.xlu1 %v353_v1, %s765_s27  ;;  %314 = vrot.lane.b32.xlu0 %v353_v1, %s766_s28 }
  0x1f   : > { %344 = vrot.lane.b32.xlu1 %v332_v4, %s767_s29  ;;  %337 = vrot.lane.b32.xlu0 %v353_v1, %s767_s29 }
  0x23   : > { %398 = vrot.lane.b32.xlu1 %v353_v1, %s768_s30  ;;  %335 = vrot.lane.b32.xlu0 %v350_v0, %s767_s29 }
  0x27   : > { %440 = vrot.lane.b32.xlu1 %v353_v1, %s769_s5  ;;  %404 = vrot.lane.b32.xlu0 %v393_v5, %s768_s30 }
  0x2b   : > { %396 = vrot.lane.b32.xlu1 %v350_v0, %s768_s30  ;;  %446 = vrot.lane.b32.xlu0 %v435_v6, %s769_s5 }
  0x2f   : > { %379 = vrot.lane.b32.xlu1 %v353_v1, %s770_s6  ;;  %438 = vrot.lane.b32.xlu0 %v350_v0, %s769_s5 }
  0x33   : > { %421 = vrot.lane.b32.xlu1 %v353_v1, %s771_s7  ;;  %386 = vrot.lane.b32.xlu0 %v374_v7, %s770_s6 }
  0x37   : > { %377 = vrot.lane.b32.xlu1 %v350_v0, %s770_s6  ;;  %428 = vrot.lane.b32.xlu0 %v416_v9, %s771_s7 }
  0x3b   : > { %463 = vrot.lane.b32.xlu1 %v353_v1, %s773_s8  ;;  %419 = vrot.lane.b32.xlu0 %v350_v0, %s771_s7 }
  0x3f   : > { %461 = vrot.lane.b32.xlu1 %v350_v0, %s773_s8  ;;  %470 = vrot.lane.b32.xlu0 %v458_v10, %s773_s8  ;;  %v478_v10 = vld [vmem:[%s862_s2] sm:$0xff] }
  0x43   : > { %492 = vperm.xlu0 %739, %v489_v12  }
  0x85   : > { %v355_v13 = vpop.permute.xlu1 %354  ;;  %v313_v14 = vpop.permute.xlu0 %312 }
  0x89   : > { %v363_v15 = vpop.permute.xlu1 %362  ;;  %v321_v16 = vpop.permute.xlu0 %320 }
  0x8d   : > { %v357_v17 = vpop.permute.xlu1 %356  ;;  %v315_v18 = vpop.permute.xlu0 %314 }
  0x8e   : > { %v359_v19 = vsel %vm358_vm0, %v355_v13, %v357_v17  ;;  %v365_v20 = vsel %vm358_vm0, %v357_v17, %v363_v15  ;;  %v317_v21 = vsel %vm316_vm1, %v313_v14, %v315_v18  ;;  %v323_v22 = vsel %vm316_vm1, %v315_v18, %v321_v16 }
  0x8f   : > { %v367_v23 = vrot.slane %v359_v19, 4  ;;  %v368_v24 = vrot.slane %v365_v20, 4  ;;  %v325_v25 = vrot.slane %v317_v21, 4  ;;  %v326_v26 = vrot.slane %v323_v22, 4 }
  0x91   : > { %371 = vst [vmem:[#allocation2 + $0x10] sm:$0xf0] %v367_v23  ;;  %372 = vst [vmem:[#allocation2 + $0x18] sm:$0xf0] %v368_v24  ;;  %v345_v27 = vpop.permute.xlu1 %344  ;;  %v338_v28 = vpop.permute.xlu0 %337 }
  0x92   : > { %329 = vst [vmem:[#allocation2] sm:$0xf0] %v325_v25  ;;  %330 = vst [vmem:[#allocation2 + $0x8] sm:$0xf0] %v326_v26  ;;  %v347_v29 = vsel %vm339_vm2, %v338_v28, %v345_v27 }
  0x93   : > { %349 = vst [vmem:[#allocation2 + $0x18] sm:$0xf] %v347_v29 }
  0x95   : > { %v399_v30 = vpop.permute.xlu1 %398  ;;  %v336_v31 = vpop.permute.xlu0 %335 }
  0x96   : > { %v340_v32 = vsel %vm339_vm2, %v336_v31, %v338_v28 }
  0x97   : > { %348 = vst [vmem:[#allocation2 + $0x10] sm:$0xf] %v340_v32 }
  0x99   : > { %v441_v33 = vpop.permute.xlu1 %440  ;;  %v405_v34 = vpop.permute.xlu0 %404  ;;  %v480_v36 = vld [vmem:[#allocation2 + $0x8] sm:$0xff]  ;;  %v479_v44 = vld [vmem:[#allocation2] sm:$0xff] }
  0x9a   : > { %v407_v35 = vsel %vm400_vm3, %v399_v30, %v405_v34  ;;  %v482_v37 = vld [vmem:[#allocation2 + $0x18] sm:$0xff] }
  0x9b   : > { %v410_v38 = vrot.slane %v407_v35, 4  ;;  %v694_v39 = vpack.c.bf16 %v482_v37, %v480_v36 }
  0x9d   : > { %414 = vst [vmem:[#allocation2 + $0x28] sm:$0xf0] %v410_v38  ;;  %v397_v40 = vpop.permute.xlu1 %396  ;;  %v447_v41 = vpop.permute.xlu0 %446  ;;  %695 = vmatprep.subr.bf16.mxu0 %v694_v39 }
  0x9e   : > { %v401_v42 = vsel %vm400_vm3, %v397_v40, %v399_v30  ;;  %v449_v43 = vsel %vm442_vm4, %v441_v33, %v447_v41  ;;  %v481_v45 = vld [vmem:[#allocation2 + $0x10] sm:$0xff] }
  0x9f   : > { %v409_v46 = vrot.slane %v401_v42, 4  ;;  %v452_v47 = vrot.slane %v449_v43, 4  ;;  %v696_v48 = vpack.c.bf16 %v481_v45, %v479_v44 }
  0xa1   : > { %413 = vst [vmem:[#allocation2 + $0x20] sm:$0xf0] %v409_v46  ;;  %456 = vst [vmem:[#allocation2 + $0x38] sm:$0xf0] %v452_v47  ;;  %v380_v49 = vpop.permute.xlu1 %379  ;;  %v439_v50 = vpop.permute.xlu0 %438  ;;  %697 = vmatpush1.bf16.msra.mxu0 %v696_v48 }
  0xa2   : > { %v443_v51 = vsel %vm442_vm4, %v439_v50, %v441_v33 }
  0xa3   : > { %v451_v52 = vrot.slane %v443_v51, 4 }
  0xa5   : > { %455 = vst [vmem:[#allocation2 + $0x30] sm:$0xf0] %v451_v52  ;;  %v422_v53 = vpop.permute.xlu1 %421  ;;  %v387_v54 = vpop.permute.xlu0 %386 }
  0xa6   : > { %v389_v55 = vsel %vm381_vm5, %v380_v49, %v387_v54 }
  0xa7   : > { %391 = vst [vmem:[#allocation2 + $0x28] sm:$0xf] %v389_v55 }
  0xa9   : > { %v378_v56 = vpop.permute.xlu1 %377  ;;  %v429_v57 = vpop.permute.xlu0 %428 }
  0xaa   : > { %v382_v58 = vsel %vm381_vm5, %v378_v56, %v380_v49  ;;  %v431_v59 = vsel %vm423_vm6, %v422_v53, %v429_v57 }
  0xab   : > { %390 = vst [vmem:[#allocation2 + $0x20] sm:$0xf] %v382_v58  ;;  %433 = vst [vmem:[#allocation2 + $0x38] sm:$0xf] %v431_v59 }
  0xad   : > { %v464_v60 = vpop.permute.xlu1 %463  ;;  %v420_v61 = vpop.permute.xlu0 %419 }
  0xae   : > { %v424_v62 = vsel %vm423_vm6, %v420_v61, %v422_v53  ;;  %v484_v3 = vld [vmem:[#allocation2 + $0x28] sm:$0xff] }
  0xaf   : > { %432 = vst [vmem:[#allocation2 + $0x30] sm:$0xf] %v424_v62 }
  0xb1   : > { %v462_v63 = vpop.permute.xlu1 %461  ;;  %v471_v0 = vpop.permute.xlu0 %470 }
  0xb2   : > { %v466_v1 = vsel %vm465_vm7, %v462_v63, %v464_v60  ;;  %v473_v2 = vsel %vm465_vm7, %v464_v60, %v471_v0  ;;  %v486_v4 = vld [vmem:[#allocation2 + $0x38] sm:$0xff]  ;;  %v483_v6 = vld [vmem:[#allocation2 + $0x20] sm:$0xff] }
  0xb3   : > { %474 = vst [vmem:[#allocation2 + $0x40] sm:$0xf] %v466_v1  ;;  %475 = vst [vmem:[#allocation2 + $0x48] sm:$0xf] %v473_v2  ;;  %v698_v5 = vpack.c.bf16 %v486_v4, %v484_v3 }
  0xb5   : > { %699 = vmatprep.subr.bf16.mxu0 %v698_v5 }
  0xb6   : > { %v485_v7 = vld [vmem:[#allocation2 + $0x30] sm:$0xff] }
  0xb7   : > { %v700_v8 = vpack.c.bf16 %v485_v7, %v483_v6 }
  0xb9   : > { %701 = vmatpush1.bf16.msra.mxu0 %v700_v8 }
  0xba   : > { %v488_v9 = vld [vmem:[#allocation2 + $0x48] sm:$0xff]  ;;  %v487_v11 = vld [vmem:[#allocation2 + $0x40] sm:$0xff] }
  0xbb   : > { %507 = vmatprep.subr.mxu0 %v488_v9 }
  0xbd   : > { %508 = vmatpush1.msra.mxu0 %v487_v11 }
  0xbe   : > { %688 = vmatmul.mubr.msk.f32.vlgmr.msra.gmra.mrb[0].mxu0 %vm495_vm8, %v478_v10 }
  0xc2   : > { %v493_v12 = vpop.permute.xlu0 %492 }
 0x191   : > { %v565_v13 = vpop.f32.mrb[0].mxu0 }
 0x192   : > { %v566_v14 = vadd.f32 %v565_v13, %v493_v12  ;;  %v567_v15 = vpop.f32.mrb[1].mxu0 }
 0x193   : > { %v568_v16 = vadd.f32 %v567_v15, %v493_v12 }
 0x194   : > { %v570_v17 = vmax.f32 %v566_v14, 0.0 }
 0x195   : > { %v571_v18 = vmax.f32 %v568_v16, 0.0 }
 0x196   : > { %572 = vst [vmem:[%s300_s20] sm:$0xff] %v570_v17 }
 0x197   : > { %573 = vst [vmem:[%s300_s20 + $0x8] sm:$0xff] %v571_v18 }
 0x198 PF: > { %s14_s17 = sadd.s32 1, %s763_s17   ;;  %s865_s15 = smov %s759_s16 }
 0x199   : > { %p11_p5 = scmp.ge.s32.totalorder %s14_s17, 4   ;;  %s866_s16 = smov %s868_s18 }
 0x19b   :  { %13 = sbr.rel (!%p11_p5) target bundleno = 2 (0x2), region = 69 }

</bundles_post_ra>
